<compile_context>
chip_gen: v6e
topology: v6e:2x2x1
jax: 0.10.0
libtpu: 0.0.40
codegen_flags: <defaults>
</compile_context>

<pallas_src>
import functools

import jax
import jax.numpy as jnp
from jax.experimental import pallas as pl
from jax.experimental.pallas import tpu as pltpu

BN_EPS = 1e-5   # nn.BatchNorm2d default
LN_EPS = 1e-5   # nn.LayerNorm default


# ----------------------- per-generation VMEM budget -------------------------

@functools.lru_cache(maxsize=None)
def _vmem_limit_bytes():
    """48 MiB on v7x (64 MiB physical), ~96 MiB on v5e/v6e (128 MiB physical)."""
    cap = None
    try:
        cap = int(pltpu.get_tpu_info().vmem_capacity_bytes)
    except Exception:
        cap = None
    if not cap or cap <= 0:
        cap = 64 * 1024 * 1024
    return int(min(cap * 3 // 4, 100 * 1024 * 1024))


def _compiler_params(dimension_semantics):
    return pltpu.CompilerParams(dimension_semantics=dimension_semantics,
                                vmem_limit_bytes=_vmem_limit_bytes())


def _pick_tile(n, prefs, *, align, other_steps=1, min_steps=8):
    """Largest aligned divisor of n that still yields >= min_steps grid steps
    (pipeline depth / v7x 2-TC sharding); else the divisor maximizing steps."""
    divs = [t for t in prefs if n % t == 0 and t % align == 0]
    for t in divs:                       # prefs are descending
        if (n // t) * other_steps >= min_steps:
            return t
    if divs:
        return divs[-1]                  # most steps we can get from the prefs
    return n                             # last resort for awkward n (kept correct)


# ----------------------- BN statistics helpers ------------------------------

def _emit_stats(stats_ref, z):
    """Per-tile BN partials for an f32 tile z of shape (n, C).

    Row 0: per-channel sum; row 1: centered sum-of-squares about the *tile*
    mean (two-pass -> avoids meansq-mean^2 cancellation); rows 2..7: zero.
    Combined across tiles outside the kernel with the parallel-variance rule.
    """
    n, c = z.shape
    s = jnp.sum(z, axis=0, keepdims=True)
    mu = s / n
    m2 = jnp.sum((z - mu) ** 2, axis=0, keepdims=True)
    stats_ref[...] = jnp.concatenate(
        [s, m2, jnp.zeros((6, c), jnp.float32)], axis=0).reshape(stats_ref.shape)


def _bn_scale_shift(stats, rows_per_tile, eps=BN_EPS):
    """Fold per-tile (sum, M2) into BN scale/shift (gamma=1, beta=0, biased var)."""
    s = stats[:, 0, :].astype(jnp.float32)    # (T, C)
    m2 = stats[:, 1, :].astype(jnp.float32)   # (T, C)
    total = rows_per_tile * stats.shape[0]
    mean = jnp.sum(s, axis=0) / total
    mu_t = s / rows_per_tile
    var = (jnp.sum(m2, axis=0)
           + rows_per_tile * jnp.sum((mu_t - mean) ** 2, axis=0)) / total
    scale = jax.lax.rsqrt(jnp.maximum(var, 0.0) + eps)
    shift = -mean * scale
    c = stats.shape[-1]
    return scale.reshape(1, c), shift.reshape(1, c)


def _branch_scale_shift(stats, rows_per_tile):
    """stats: (B, 4, 8, C) -> per-branch folded BN scale/shift, each (4, 1, C)."""
    scs, shs = [], []
    for br in range(stats.shape[1]):
        sc, sh = _bn_scale_shift(stats[:, br], rows_per_tile)
        scs.append(sc)
        shs.append(sh)
    return jnp.stack(scs, axis=0), jnp.stack(shs, axis=0)


# ----------------------- 1x1 input projection (reads native NCHW) -----------

def _proj_kernel(x_ref, w_ref, b_ref, o_ref, stats_ref):
    # x_ref: (1, Cin, TM) f32 block of the *untransposed* NCHW input.  The
    # channels-last transpose + bf16 cast are folded into the MXU op via a
    # dim-0-contracting dot_general (no external HBM transpose pass).
    x = x_ref[0].astype(jnp.bfloat16)                                  # (Cin, TM)
    z = jax.lax.dot_general(x, w_ref[...], (((0,), (0,)), ((), ())),
                            preferred_element_type=jnp.float32)        # (TM, D)
    z = z + b_ref[...]
    o_ref[...] = z.reshape(o_ref.shape).astype(o_ref.dtype)
    _emit_stats(stats_ref, z)


def proj_1x1(x, w, b, tm):
    # x: [B, Cin, H*W] f32 (free reshape of NCHW src); w: [Cin, D] bf16.
    B, Cin, HW = x.shape
    D = w.shape[1]
    nm = HW // tm
    return pl.pallas_call(
        _proj_kernel,
        out_shape=(jax.ShapeDtypeStruct((B, HW, D), jnp.bfloat16),
                   jax.ShapeDtypeStruct((B, nm, 8, D), jnp.float32)),
        grid=(B, nm),
        in_specs=[pl.BlockSpec((1, Cin, tm), lambda b, m: (b, 0, m)),
                  pl.BlockSpec((Cin, D), lambda b, m: (0, 0)),
                  pl.BlockSpec((1, D), lambda b, m: (0, 0))],
        out_specs=(pl.BlockSpec((1, tm, D), lambda b, m: (b, m, 0)),
                   pl.BlockSpec((1, 1, 8, D), lambda b, m: (b, m, 0, 0))),
        compiler_params=_compiler_params(("parallel", "parallel")),
    )(x, w, b.reshape(1, D))


# ----------------------- 4-branch fused 3x3 dilated conv --------------------
# One pallas_call per conv stage, grid = (B, 4 branches).  The branch axis is
# "arbitrary": for stage 1 the shared input block index is branch-invariant
# (one DMA per image) and its BN+ReLU is cached in VMEM at branch step 0.
# TODO(synk): add H-row halo tiling (grid=(B, n_row_tiles, 4)) for feature maps
# whose per-image VMEM footprint exceeds the v7x budget.

def _dilated_conv_kernel(col_ref, x_ref, sc_ref, sh_ref, w_ref,
                         o_ref, stats_ref, xn_ref, acc_ref,
                         *, H, W, dilations, cache_norm):
    HW = H * W
    C = xn_ref.shape[-1]
    br = pl.program_id(1)

    def normalize():
        # fused BN(scale/shift) + ReLU of this kernel's *input* (f32 math)
        x = x_ref[...].reshape(HW, C).astype(jnp.float32)
        xn_ref[...] = jnp.maximum(x * sc_ref[0] + sh_ref[0], 0.0)

    if cache_norm:
        # shared input (stage 1): normalize once per image, reuse across branches
        @pl.when(br == 0)
        def _():
            normalize()
    else:
        normalize()

    col = col_ref[...]                       # (HW, 1) int32, col(m) = m % W

    for idx, d in enumerate(dilations):
        @pl.when(br == idx)
        def _(d=d):
            xn = xn_ref[...]                 # (HW, C) f32, BN+ReLU applied

            def col_shift(dx):
                # y[m] = xn[m + dx] if the tap stays inside the image row, else 0.
                # Shift on the XLU via roll; boundary handled by a VPU select
                # (no jnp.pad, no concatenate-with-zeros copies).
                if dx == 0:
                    return xn.astype(jnp.bfloat16)
                rolled = pltpu.roll(xn, shift=(-dx) % HW, axis=0)
                valid = (col + dx >= 0) & (col + dx < W)
                return jnp.where(valid, rolled, 0.0).astype(jnp.bfloat16)

            # lane-concatenated long-K operand reused by every ky: (HW, 3C) bf16
            xcat = jnp.concatenate(
                [col_shift(-d), col_shift(0), col_shift(d)], axis=-1)

            # ky == 1 (dy == 0) covers every output row -> initializes the acc.
            acc_ref[...] = jnp.dot(xcat, w_ref[0, 1],
                                   preferred_element_type=jnp.float32)
            # ky == 0 / 2: valid row range only (less MXU work than full rows).
            # NOTE: offsets are multiples of W; W % 8 == 0 keeps the scratch
            # read-modify-write sublane aligned (otherwise correct but slower).
            for ky in (0, 2):
                dy = (ky - 1) * d
                L = (H - abs(dy)) * W
                if L <= 0:
                    continue
                src0 = max(0, dy) * W
                dst0 = max(0, -dy) * W
                acc_ref[dst0:dst0 + L, :] += jnp.dot(
                    xcat[src0:src0 + L, :], w_ref[0, ky],
                    preferred_element_type=jnp.float32)

            acc = acc_ref[...]
            o_ref[...] = acc.reshape(o_ref.shape).astype(o_ref.dtype)
            _emit_stats(stats_ref, acc)


def dilated_conv_stage(x, scale, shift, w_stack, col_ids, dilations, *,
                       H, W, stage_one):
    """One conv stage for all 4 dilation branches.

    stage_one: x is the shared [B, HW, C] input (branch-invariant block ->
               single DMA + cached BN/ReLU); otherwise x is per-branch
               [B, 4, HW, C] and scale/shift are per-branch (4, 1, C).
    """
    B = x.shape[0]
    HW = H * W
    C = x.shape[-1]
    Co = w_stack.shape[-1]
    nbr = len(dilations)

    if stage_one:
        x_spec = pl.BlockSpec((1, HW, C), lambda b, r: (b, 0, 0))
        sc_map = lambda b, r: (0, 0, 0)
    else:
        x_spec = pl.BlockSpec((1, 1, HW, C), lambda b, r: (b, r, 0, 0))
        sc_map = lambda b, r: (r, 0, 0)

    kernel = functools.partial(_dilated_conv_kernel, H=H, W=W,
                               dilations=tuple(dilations),
                               cache_norm=stage_one)
    return pl.pallas_call(
        kernel,
        out_shape=(jax.ShapeDtypeStruct((B, nbr, HW, Co), jnp.bfloat16),
                   jax.ShapeDtypeStruct((B, nbr, 8, Co), jnp.float32)),
        grid=(B, nbr),
        in_specs=[pl.BlockSpec((HW, 1), lambda b, r: (0, 0)),
                  x_spec,
                  pl.BlockSpec((1, 1, C), sc_map),
                  pl.BlockSpec((1, 1, C), sc_map),
                  pl.BlockSpec((1, 3, 3 * C, Co), lambda b, r: (r, 0, 0, 0))],
        out_specs=(pl.BlockSpec((1, 1, HW, Co), lambda b, r: (b, r, 0, 0)),
                   pl.BlockSpec((1, 1, 8, Co), lambda b, r: (b, r, 0, 0))),
        scratch_shapes=[pltpu.VMEM((HW, C), jnp.float32),     # cached BN+ReLU input
                        pltpu.VMEM((HW, Co), jnp.float32)],   # conv accumulator
        # branch axis must stay sequential (scratch reuse / input-block reuse);
        # the batch axis shards across the 2 TensorCores on v7x.
        compiler_params=_compiler_params(("parallel", "arbitrary")),
    )(col_ids, x, scale, shift, w_stack)


# ----------------------- conv_fusion (consumes 4 pre-BN branches) -----------

def _fusion_kernel(y_ref, sc_ref, sh_ref, wf_ref, o_ref, stats_ref):
    acc = None
    for i in range(4):
        a = jnp.maximum(y_ref[0, i].astype(jnp.float32) * sc_ref[i:i + 1, :]
                        + sh_ref[i:i + 1, :], 0.0)
        t = jnp.dot(a.astype(jnp.bfloat16), wf_ref[i],
                    preferred_element_type=jnp.float32)
        acc = t if acc is None else acc + t
    o_ref[...] = acc.reshape(o_ref.shape).astype(o_ref.dtype)
    _emit_stats(stats_ref, acc)


def fusion_1x1(y, scales, shifts, wf, tm):
    # y: stacked pre-BN branch outputs [B, 4, HW, D]; no [M, 4D] concat in HBM.
    B, nbr, HW, D = y.shape
    nm = HW // tm
    return pl.pallas_call(
        _fusion_kernel,
        out_shape=(jax.ShapeDtypeStruct((B, HW, D), jnp.bfloat16),
                   jax.ShapeDtypeStruct((B, nm, 8, D), jnp.float32)),
        grid=(B, nm),
        in_specs=[pl.BlockSpec((1, nbr, tm, D), lambda b, m: (b, 0, m, 0)),
                  pl.BlockSpec((nbr, D), lambda b, m: (0, 0)),
                  pl.BlockSpec((nbr, D), lambda b, m: (0, 0)),
                  pl.BlockSpec((nbr, D, D), lambda b, m: (0, 0, 0))],
        out_specs=(pl.BlockSpec((1, tm, D), lambda b, m: (b, m, 0)),
                   pl.BlockSpec((1, 1, 8, D), lambda b, m: (b, m, 0, 0))),
        compiler_params=_compiler_params(("parallel", "parallel")),
    )(y, scales, shifts, wf)


# ----------------------- final fused BN + ReLU + LayerNorm ------------------

def _bn_relu_ln_kernel(x_ref, scale_ref, shift_ref, o_ref, *, eps):
    y = jnp.maximum(x_ref[...].astype(jnp.float32) * scale_ref[...]
                    + shift_ref[...], 0.0)
    mu = jnp.mean(y, axis=-1, keepdims=True)
    var = jnp.mean((y - mu) ** 2, axis=-1, keepdims=True)
    o_ref[...] = ((y - mu) * jax.lax.rsqrt(var + eps)).astype(o_ref.dtype)


def bn_relu_layernorm(x, scale, shift, tm):
    M, C = x.shape
    return pl.pallas_call(
        functools.partial(_bn_relu_ln_kernel, eps=LN_EPS),
        # memory-bound pass: emit bf16 to halve the store traffic
        out_shape=jax.ShapeDtypeStruct((M, C), jnp.bfloat16),
        grid=(M // tm,),
        in_specs=[pl.BlockSpec((tm, C), lambda i: (i, 0)),
                  pl.BlockSpec((1, C), lambda i: (0, 0)),
                  pl.BlockSpec((1, C), lambda i: (0, 0))],
        out_specs=pl.BlockSpec((tm, C), lambda i: (i, 0)),
        compiler_params=_compiler_params(("parallel",)),
    )(x, scale, shift)


# ----------------------------- parameters ----------------------------------

def init_params(key, in_channels, d_model):
    """Synthetic init mirroring the module's shapes (kaiming fan_out, relu).
    NOTE: real PyTorch Conv2d weights are [Cout, Cin, kh, kw]; port trained
    weights by transposing 3x3 weights to [kh, kw, Cin, Cout] then reshaping to
    [3, 3*Cin, Cout], 1x1 weights to [Cin, Cout], and splitting conv_fusion's
    Cin = 4*d axis into the leading 4 branch groups."""
    ks = jax.random.split(key, 11)

    def kaiming(k, shape, fan_out):
        return (jax.random.normal(k, shape, jnp.float32)
                * jnp.sqrt(2.0 / fan_out)).astype(jnp.bfloat16)

    d = d_model
    params = {
        "proj_w": kaiming(ks[0], (in_channels, d), d),
        "proj_b": 0.01 * jax.random.normal(ks[1], (d,), jnp.float32),
    }
    w1, w2 = [], []
    i = 2
    for _ in range(4):
        w1.append(kaiming(ks[i], (3, 3, d, d), d * 9).reshape(3, 3 * d, d)); i += 1
        w2.append(kaiming(ks[i], (3, 3, d, d), d * 9).reshape(3, 3 * d, d)); i += 1
    params["w1"] = jnp.stack(w1, axis=0)       # (4, 3, 3d, d): per-branch conv1
    params["w2"] = jnp.stack(w2, axis=0)       # (4, 3, 3d, d): per-branch conv2
    # conv_fusion Conv2d(4*d, d, 1, bias=False): stored as 4 chunks of [d, d]
    params["fuse_w"] = kaiming(ks[i], (4, d, d), d)
    return params


# ------------------------------- forward ------------------------------------

def dilated_conv_encoder(params, src, mask=None):
    """src: [B, C_in, H, W] (NCHW, same as PyTorch). Returns ([B, H*W, d], mask).

    BatchNorm uses training-mode batch statistics with gamma=1/beta=0 (no
    running stats), LayerNorm uses its default weight=1/bias=0 -- matching the
    freshly-initialized PyTorch module in training mode."""
    B, Cin, H, W = src.shape
    D = params["proj_w"].shape[1]
    HW = H * W
    M = B * HW
    dils = (2, 4, 6, 8)

    # free metadata reshape; transpose + bf16 cast happen inside the proj kernel
    x = src.reshape(B, Cin, HW)

    # input_proj (1x1 conv + bias) -> pre-BN output [B, HW, D] + per-tile stats
    tm_p = _pick_tile(HW, (512, 256, 128), align=128, other_steps=B)
    z0, st0 = proj_1x1(x, params["proj_w"], params["proj_b"], tm_p)
    sc0, sh0 = _bn_scale_shift(st0.reshape(-1, 8, D), tm_p)
    sc0 = sc0.reshape(1, 1, D)
    sh0 = sh0.reshape(1, 1, D)

    # column index of every flattened pixel (used for the roll boundary masks)
    col_ids = (jnp.arange(HW, dtype=jnp.int32) % W).reshape(HW, 1)

    # stage-1 convs of all 4 branches in one kernel (shared z0, cached BN+ReLU)
    y1, st1 = dilated_conv_stage(z0, sc0, sh0, params["w1"], col_ids, dils,
                                 H=H, W=W, stage_one=True)
    sc1, sh1 = _branch_scale_shift(st1, HW)
    # stage-2 convs of all 4 branches in one kernel (per-branch inputs/BN)
    y2, st2 = dilated_conv_stage(y1, sc1, sh1, params["w2"], col_ids, dils,
                                 H=H, W=W, stage_one=False)
    sc2, sh2 = _branch_scale_shift(st2, HW)

    # conv_fusion (1x1, no bias): consumes the 4 pre-BN branch outputs directly
    # (per-branch BN+ReLU applied in-kernel) -- no [M, 4D] concat in HBM.
    tm_f = _pick_tile(HW, (512, 256, 128, 64, 32, 16, 8), align=8, other_steps=B)
    zf, stf = fusion_1x1(y2, sc2.reshape(4, D), sh2.reshape(4, D),
                         params["fuse_w"], tm_f)
    scf, shf = _bn_scale_shift(stf.reshape(-1, 8, D), tm_f)

    # final BN + ReLU fused with LayerNorm over d_model, then flatten/permute
    tm_l = _pick_tile(M, (1024, 512, 256, 128, 64, 32, 16, 8), align=8)
    out = bn_relu_layernorm(zf.reshape(M, D), scf, shf, tm_l).reshape(B, HW, D)

    if mask is not None:
        # TODO(synk): F.interpolate nearest-resize of the padding mask to (h, w)
        # + flatten is not ported; only the mask=None path is supported.
        mask = None
    return out, mask


# --------------------------------- main --------------------------------------

if __name__ == "__main__":
    key = jax.random.PRNGKey(0)
    kp, kx = jax.random.split(key)

    # small, lane-friendly shapes (real module: in_channels=2048, d_model=256)
    B, Cin, H, W, d_model = 2, 256, 16, 16, 128

    params = init_params(kp, Cin, d_model)
    src = jax.random.normal(kx, (B, Cin, H, W), jnp.float32)

    out, mask = dilated_conv_encoder(params, src, mask=None)
    out = jax.block_until_ready(out)

    assert out.shape == (B, H * W, d_model)
    assert mask is None
    assert bool(jnp.all(jnp.isfinite(out.astype(jnp.float32))))
    print("KERNEL_OK")
</pallas_src>

<mosaic_0001>
module attributes {stable_mosaic.version = 11 : i64} {
  func.func @_proj_kernel(%arg0: i32, %arg1: i32, %arg2: memref<1x256x128xf32, #tpu.memory_space<vmem>>, %arg3: memref<256x128xbf16, #tpu.memory_space<vmem>>, %arg4: memref<1x128xf32, #tpu.memory_space<vmem>>, %arg5: memref<1x128x128xbf16, #tpu.memory_space<vmem>>, %arg6: memref<1x1x8x128xf32, #tpu.memory_space<vmem>>) attributes {dimension_semantics = [#tpu.dimension_semantics<parallel>, #tpu.dimension_semantics<parallel>], iteration_bounds = array<i64: 2, 2>, scalar_prefetch = 0 : i64, scratch_operands = 0 : i64, tpu.core_type = #tpu.core_type<tc>, window_params = [{transform_indices = @transform_0, window_bounds = array<i64: 1, 256, 128>}, {pipeline_mode = #tpu.pipeline_mode<synchronous>, transform_indices = @transform_1, window_bounds = array<i64: 256, 128>}, {pipeline_mode = #tpu.pipeline_mode<synchronous>, transform_indices = @transform_2, window_bounds = array<i64: 1, 128>}, {transform_indices = @transform_3, window_bounds = array<i64: 1, 128, 128>}, {transform_indices = @transform_4, window_bounds = array<i64: 1, 1, 8, 128>}]} {
    %c0 = arith.constant 0 : index
    %c0_0 = arith.constant 0 : index
    %c0_1 = arith.constant 0 : index
    %0 = vector.load %arg2[%c0, %c0_0, %c0_1] : memref<1x256x128xf32, #tpu.memory_space<vmem>>, vector<1x256x128xf32>
    %1 = vector.shape_cast %0 : vector<1x256x128xf32> to vector<256x128xf32>
    %2 = arith.truncf %1 : vector<256x128xf32> to vector<256x128xbf16>
    %c0_2 = arith.constant 0 : index
    %c0_3 = arith.constant 0 : index
    %3 = vector.load %arg3[%c0_2, %c0_3] : memref<256x128xbf16, #tpu.memory_space<vmem>>, vector<256x128xbf16>
    %cst = arith.constant dense<0.000000e+00> : vector<128x128xf32>
    %4 = tpu.matmul %2, %3, %cst {dimension_numbers = #tpu.dot_dimension_numbers<[0], [0], [1], [1], [0, 1, 1, 1], [], []>} : vector<256x128xbf16>, vector<256x128xbf16>, vector<128x128xf32> -> vector<128x128xf32>
    %c0_4 = arith.constant 0 : index
    %c0_5 = arith.constant 0 : index
    %5 = vector.load %arg4[%c0_4, %c0_5] : memref<1x128xf32, #tpu.memory_space<vmem>>, vector<1x128xf32>
    %6 = vector.broadcast %5 : vector<1x128xf32> to vector<128x128xf32>
    %7 = arith.addf %4, %6 : vector<128x128xf32>
    %8 = vector.shape_cast %7 : vector<128x128xf32> to vector<1x128x128xf32>
    %9 = arith.truncf %8 : vector<1x128x128xf32> to vector<1x128x128xbf16>
    %c0_6 = arith.constant 0 : index
    %c0_7 = arith.constant 0 : index
    %c0_8 = arith.constant 0 : index
    %10 = vector.load %arg5[%c0_6, %c0_7, %c0_8] : memref<1x128x128xbf16, #tpu.memory_space<vmem>>, vector<1x128x128xbf16>
    tpu.vector_store %arg5[%c0_6, %c0_7, %c0_8], %9 {strides = array<i32>} : memref<1x128x128xbf16, #tpu.memory_space<vmem>>, vector<1x128x128xbf16>,
    %cst_9 = arith.constant dense<0.000000e+00> : vector<128xf32>
    %11 = vector.multi_reduction <add>, %7, %cst_9 [0] : vector<128x128xf32> to vector<128xf32>
    %12 = vector.shape_cast %11 : vector<128xf32> to vector<1x128xf32>
    %cst_10 = arith.constant 1.280000e+02 : f32
    %13 = vector.broadcast %cst_10 : f32 to vector<1x128xf32>
    %14 = arith.divf %12, %13 : vector<1x128xf32>
    %15 = vector.broadcast %14 : vector<1x128xf32> to vector<128x128xf32>
    %16 = arith.subf %7, %15 : vector<128x128xf32>
    %17 = arith.mulf %16, %16 : vector<128x128xf32>
    %cst_11 = arith.constant dense<0.000000e+00> : vector<128xf32>
    %18 = vector.multi_reduction <add>, %17, %cst_11 [0] : vector<128x128xf32> to vector<128xf32>
    %19 = vector.shape_cast %18 : vector<128xf32> to vector<1x128xf32>
    %cst_12 = arith.constant 0.000000e+00 : f32
    %20 = vector.broadcast %cst_12 : f32 to vector<6x128xf32>
    %21 = tpu.concatenate %12, %19, %20 in 0 : vector<1x128xf32>, vector<1x128xf32>, vector<6x128xf32> -> vector<8x128xf32>
    %22 = vector.shape_cast %21 : vector<8x128xf32> to vector<1x1x8x128xf32>
    %c0_13 = arith.constant 0 : index
    %c0_14 = arith.constant 0 : index
    %c0_15 = arith.constant 0 : index
    %c0_16 = arith.constant 0 : index
    %23 = vector.load %arg6[%c0_13, %c0_14, %c0_15, %c0_16] : memref<1x1x8x128xf32, #tpu.memory_space<vmem>>, vector<1x1x8x128xf32>
    tpu.vector_store %arg6[%c0_13, %c0_14, %c0_15, %c0_16], %22 {strides = array<i32>} : memref<1x1x8x128xf32, #tpu.memory_space<vmem>>, vector<1x1x8x128xf32>,
    return
  }
  func.func @transform_0(%arg0: i32, %arg1: i32) -> (i32, i32, i32) {
    %c0_i32 = arith.constant 0 : i32
    %c0_i32_0 = arith.constant 0 : i32
    return %arg0, %c0_i32, %arg1 : i32, i32, i32
  }
  func.func @transform_1(%arg0: i32, %arg1: i32) -> (i32, i32) {
    %c0_i32 = arith.constant 0 : i32
    %c0_i32_0 = arith.constant 0 : i32
    %c0_i32_1 = arith.constant 0 : i32
    return %c0_i32, %c0_i32_0 : i32, i32
  }
  func.func @transform_2(%arg0: i32, %arg1: i32) -> (i32, i32) {
    %c0_i32 = arith.constant 0 : i32
    %c0_i32_0 = arith.constant 0 : i32
    %c0_i32_1 = arith.constant 0 : i32
    return %c0_i32, %c0_i32_0 : i32, i32
  }
  func.func @transform_3(%arg0: i32, %arg1: i32) -> (i32, i32, i32) {
    %c0_i32 = arith.constant 0 : i32
    %c0_i32_0 = arith.constant 0 : i32
    return %arg0, %arg1, %c0_i32 : i32, i32, i32
  }
  func.func @transform_4(%arg0: i32, %arg1: i32) -> (i32, i32, i32, i32) {
    %c0_i32 = arith.constant 0 : i32
    %c0_i32_0 = arith.constant 0 : i32
    %c0_i32_1 = arith.constant 0 : i32
    return %arg0, %arg1, %c0_i32, %c0_i32_0 : i32, i32, i32, i32
  }
}

</mosaic_0001>

<bundles_post_ra>
// kernel: tpu_custom_call.1
= control target key start
LH: loop header
LB: loop body
LE: loop exit
PB: predicated region body
PF: predicated region fallthrough
CT: control target
= control target key end

     0   :  { %s1817_s0 = inlined_call_operand.hbm [shape: f32[2,256,256], index: 0, kind: input, shape index: {}]   ;;  %s1818_s1 = inlined_call_operand.hbm [shape: bf16[256,128], index: 1, kind: input, shape index: {}]   ;;  %s1819_s2 = inlined_call_operand.vmem [shape: f32[1,128], index: 2, kind: input, shape index: {}]   ;;  %s1820_s3 = inlined_call_operand.hbm [shape: bf16[2,256,128], index: 3, kind: output, shape index: {0}]   ;;  %s1821_s4 = inlined_call_operand.hbm [shape: f32[2,2,8,128], index: 4, kind: output, shape index: {1}]  }
   0x1   :  { %1831 = sst [smem:[#allocation18_spill]] %s1818_s1 }
   0x2   :  { %1832 = sst [smem:[#allocation19_spill]] %s1821_s4 }
   0x3   :  { %10 = vsyncpa [#allocation3], 0 }
   0x4   :  { %12 = vsyncpa [#allocation3 + $0x1], 0 }
   0x5   :  { %13 = vsyncpa [#allocation6], 0 }
   0x6   :  { %14 = vsyncpa [#allocation4], 0 }
   0x7   :  { %16 = vsyncpa [#allocation4 + $0x1], 0 }
   0x8   :  { %17 = vsyncpa [#allocation9], 0 }
   0x9   :  { %19 = vsyncpa [#allocation9 + $0x1], 0  ;;  %s1442_s15 = smov 0   ;;  %s1444_s16 = smov 0  }
   0xa   :  { %s1446_s17 = smov 0   ;;  %s1448_s18 = smov 0  }
   0xb   :  { %s1450_s19 = smov 0   ;;  %s1452_s20 = smov 0  }
   0xc   :  { %s1454_s21 = smov 0   ;;  %s1456_s22 = smov 0  }
   0xd LB: > { %1833 = sst [smem:[#allocation14_spill]] %s1376_s15  ;;  %s905_s23 = sadd.s32 4294967295, %s1404_s22   ;;  %s1404_s22 = sphi %s1456_s22, %s25_s22   ;;  %s1400_s21 = sphi %s1454_s21, %s1862_s21   ;;  %s1396_s20 = sphi %s1452_s20, %s1861_s20   ;;  %s1392_s19 = sphi %s1450_s19, %s1860_s19   ;;  %s1388_s18 = sphi %s1448_s18, %s1859_s18   ;;  %s1384_s17 = sphi %s1446_s17, %s1858_s17   ;;  %s1380_s16 = sphi %s1444_s16, %s1857_s16   ;;  %s1376_s15 = sphi %s1442_s15, %s1856_s15  }
   0xe   : > { %1834 = sst [smem:[#allocation15_spill]] %s1404_s22  ;;  %s906_s24 = sadd.s32 4294967294, %s1404_s22  }
   0xf   : > { %p53_p0 = scmp.ne.s32.totalorder %s1384_s17, %s1380_s16  ;;  %p54_p1 = scmp.eq.s32.totalorder %s1404_s22, 0 }
  0x10   : > { %p59_p2 = scmp.ne.s32.totalorder %s1380_s16, %s1376_s15  ;;  %p1490_p3 = scmp.eq.s32.totalorder %s905_s23, 0 }
  0x11   : > { %p127_p4 = scmp.eq.s32.totalorder %s905_s23, 3  ;;  %p1494_p5 = por %p54_p1, %p53_p0 }
  0x12   : > { %p133_p6 = scmp.eq.s32.totalorder %s906_s24, 3  ;;  %p1500_p7 = por %p1490_p3, %p59_p2 }
  0x13   : > { %p1504_p8 = por %p127_p4, %p53_p0  ;;  %p907_p10 = scmp.ge.s32.totalorder %s1404_s22, 1 }
  0x14   : > { %s1837_s28 = scalar_select %p1500_p7, 1, 0 }
  0x15   : > { %s1838_s29 = scalar_select %p1504_p8, 1, 0 }
  0x16   : > { %p1508_p9 = por %p133_p6, %p59_p2  ;;  %p168_p11 = scmp.lt.s32.totalorder %s1404_s22, 5 }
  0x17   : > { %s1406_s6 = smov [#allocation5]   ;;  %p1129_p0 = scmp.lt.s32.totalorder %s1404_s22, 4 }
  0x18   : > { %s1839_s30 = scalar_select %p1508_p9, 1, 0 }
  0x19   : > { %p1514_p12 = pnand %p907_p10, %p168_p11  ;;  %s180_s7 = sshll.u32 %s1406_s6, 4  ;;  %s181_s7 = int_to_ptr.vmem [resolvable:$true] %s180_s7 }
  0x1a   : > { %1840 = sst [smem:[#allocation16_spill]] %s1839_s30  ;;  %p1529_p2 = pnand %p1129_p0, %p1494_p5 }
  0x1b   : > { %s1841_s5 = scalar_select %p1514_p12, 1, 0 }
  0x1c   : > { %p1113_p13 = pneg %p1514_p12  ;;  %s1231_s10 = scalar_lea.vmem %s181_s7, 2048 }
  0x1d   : > { %p1232_p6 = scmp.ne.s32.totalorder %s181_s7, %s1231_s10  ;;  %p1239_p9 = scmp.lt.s32.totalorder %s181_s7, %s181_s7 }
  0x1e   : > { %p1523_p1 = pnand %p1113_p13, %p1490_p3  ;;  %p1240_p8 = scmp.lt.s32.totalorder %s1231_s10, %s1231_s10 }
  0x20   : > { %p1222_p4 = pneg %p1523_p1  ;;  %p1241_p7 = por %p1240_p8, %p1239_p9 }
  0x22   : > { %p1234_p10 = pnand %p1232_p6, %p1222_p4 }
  0x24   : > { %p1235_p11 = pneg %p1234_p10 }
  0x26   : > { %p1242_p12 = pnand %p1241_p7, %p1235_p11 }
  0x28   : > { %1245 = shalt.err (!%p1242_p12)
}
  0x29   : > { %s1407_s11 = smov 64   ;;  %s1408_s12 = smov 4  }
  0x2a   : > { %s1844_s1 = sld [smem:[#allocation18_spill]]  ;;  %s34_s23 = sadd.s32 1, %s1396_s20 }
  0x2b   : > { %p35_p5 = scmp.ge.s32.totalorder %s34_s23, 2  ;;  %s37_s24 = sadd.s32 1, %s1400_s21 }
  0x2c   : > { %s197_s27 = sand.u32 1, %s1384_s17   ;;  %s911_s6 = sshll.u32 %s1400_s21, 6 }
  0x2d   : > { %s1864_s23 = smov (%p35_p5, %s34_s23), 0  ;;  %s1866_s24 = smov (!%p35_p5, %s37_s24), %s1400_s21 }
  0x2e   : > { %1845 = sst [smem:[#allocation17_spill]] %s1864_s23  ;;  %s42_s10 = ssub.s32 %s1396_s20, %s1864_s23 }
  0x2f   : > { %p39_p7 = scmp.ge.s32.totalorder %s1866_s24, 2  ;;  %s910_s8 = sshll.u32 %s197_s27, 8 }
  0x30   : > { %1116 = dma.hbm_to_vmem [thread:$0]  (!%p1523_p1), %s1844_s1, 2048, %s181_s7, [#allocation6], %s1407_s11, %s1407_s11, %s1408_s12  }
  0x31   : > { %s206_s25 = sadd.s32 %s1396_s20, %s911_s6  ;;  %s1868_s24 = smov (%p39_p7, %s1866_s24), 0 }
  0x32   : > { %s912_s7 = sshll.u32 %s206_s25, 7  ;;  %s201_s11 = scalar_lea.vmem [#allocation2], %s910_s8 }
  0x33   : > { %s209_s12 = sshll.u32 %s201_s11, 4  ;;  %s41_s13 = ssub.s32 %s1400_s21, %s1868_s24  ;;  %s210_s12 = int_to_ptr.vmem [resolvable:$true] %s209_s12 }
  0x34   : > { %s208_s30 = scalar_lea.hbm %s1817_s0, %s912_s7  ;;  %s43_s15 = sor.u32 %s42_s10, %s41_s13 }
  0x35   : > { %p44_p8 = scmp.eq.s32.totalorder %s43_s15, 0  ;;  %s1846_s22 = sadd.s32 1, %s1384_s17 }
  0x36   : > { %s198_s23 = scalar_lea.sflag [#allocation3], %s197_s27  ;;  %p1248_p9 = pneg %p1529_p2 }
  0x37   : > { %s1560_s4 = scalar_select %p44_p8, %s1384_s17, %s1846_s22  }
  0x38   : > { %s1259_s6 = scalar_lea.vmem %s210_s12, 4096  ;;  %s1409_s25 = smov [#allocation2]  }
  0x39   : > { %p1260_p12 = scmp.ne.s32.totalorder %s210_s12, %s1259_s6  ;;  %s1264_s8 = sshll.u32 %s1409_s25, 4  ;;  %s1265_s8 = int_to_ptr.vmem [resolvable:$false] %s1264_s8 }
  0x3a   : > { %s1266_s11 = scalar_lea.vmem %s1265_s8, 8192  ;;  %p1267_p1 = scmp.lt.s32.totalorder %s210_s12, %s1265_s8 }
  0x3b   : > { %p1262_p13 = pnand %p1260_p12, %p1248_p9  ;;  %p1268_p4 = scmp.lt.s32.totalorder %s1266_s11, %s1259_s6 }
  0x3d   : > { %p1263_p0 = pneg %p1262_p13  ;;  %p1269_p6 = por %p1268_p4, %p1267_p1 }
  0x3f   : > { %p1270_p10 = pnand %p1269_p6, %p1263_p0 }
  0x41   : > { %1273 = shalt.err (!%p1270_p10)
}
  0x42   : > { %s1410_s1 = smov 256   ;;  %s1411_s15 = smov 128  }
  0x43   : > { %s1412_s22 = smov 8   ;;  %p1847_p11 = scmp.ne.s32.totalorder %s1841_s5, 0 }
  0x44   : > { %1120 = dma.hbm_to_vmem [thread:$0]  (!%p1529_p2), %s208_s30, 4096, %s210_s12, %s198_s23, %s1410_s1, %s1411_s15, %s1412_s22  }
  0x45   : > { %221 = sbr.rel (%p1847_p11) target bundleno = 510 (0x1fe), region = 32  ;;  %s1569_s27 = sand.u32 (!%p1847_p11), 1, %s1380_s16  }
  0x46   : > { %s914_s10 = sshll.u32 (!%p1847_p11), %s1569_s27, 8  ;;  %s224_s7 = scalar_lea.sflag (!%p1847_p11), [#allocation3], %s1569_s27 }
  0x47   : > { %s1573_s13 = scalar_lea.vmem (!%p1847_p11), [#allocation2], %s914_s10  ;;  %p1848_p5 = scmp.ne.s32.totalorder (!%p1847_p11), %s1837_s28, 0 }
  0x4a   : > { %1359 = dma.done.wait (%p1848_p5), %s224_s7, 4096  }
  0x4b   : > { %1361 = vsyncadd (%p1848_p5), %s224_s7, 4294963200 }
  0x4c   : > { %1363 = dma.done.wait (%p1490_p3), [#allocation6], 2048  }
  0x4d   : > { %1365 = vsyncadd (%p1490_p3), [#allocation6], 4294965248  ;;  %v279_v0 = vld [vmem:[%s1573_s13 + $0x80] sm:$0xff]  ;;  %v280_v1 = vld [vmem:[%s1573_s13 + $0x88] sm:$0xff]  ;;  %s916_s30 = sshll.u32 %s1569_s27, 6  ;;  %s953_s9 = sshll.u32 %s1388_s18, 4 }
  0x4e   : > { %v263_v2 = vld [vmem:[%s1573_s13] sm:$0xff]  ;;  %v303_v3 = vpack.c.bf16 %v280_v1, %v279_v0  ;;  %v264_v4 = vld [vmem:[%s1573_s13 + $0x8] sm:$0xff]  ;;  %v281_v5 = vld [vmem:[%s1573_s13 + $0x90] sm:$0xff]  ;;  %s1629_s5 = scalar_lea.vmem [#allocation7], %s916_s30  ;;  %s954_s23 = sshll.u32 %s1392_s19, 5 }
  0x4f   : > { %v282_v6 = vld [vmem:[%s1573_s13 + $0x98] sm:$0xff]  ;;  %v295_v7 = vpack.c.bf16 %v264_v4, %v263_v2  ;;  %v265_v8 = vld [vmem:[%s1573_s13 + $0x10] sm:$0xff]  ;;  %v283_v12 = vld [vmem:[%s1573_s13 + $0xa0] sm:$0xff]  ;;  %s754_s12 = sadd.s32 %s954_s23, %s953_s9  ;;  %s757_s14 = sshll.u32 %s1629_s5, 4  ;;  %s1710_s14 = int_to_ptr.vmem [resolvable:$true] %s757_s14 }
  0x50   : > { %v266_v9 = vld [vmem:[%s1573_s13 + $0x18] sm:$0xff]  ;;  %366 = vxpose.xlu0.c.b16.start [1/8] %v303_v3, 128  ;;  %v304_v10 = vpack.c.bf16 %v282_v6, %v281_v5  ;;  %v284_v13 = vld [vmem:[%s1573_s13 + $0xa8] sm:$0xff]  ;;  %v267_v14 = vld [vmem:[%s1573_s13 + $0x20] sm:$0xff]  ;;  %s955_s6 = sshll.u32 %s754_s12, 6  ;;  %s737_s1 = scalar_lea.sflag [#allocation4], %s1569_s27 }
  0x51   : > { %350 = vxpose.xlu1.c.b16.start [1/8] %v295_v7, 128  ;;  %v296_v11 = vpack.c.bf16 %v266_v9, %v265_v8  ;;  %v268_v15 = vld [vmem:[%s1573_s13 + $0x28] sm:$0xff]  ;;  %v305_v16 = vpack.c.bf16 %v284_v13, %v283_v12  ;;  %v285_v18 = vld [vmem:[%s1573_s13 + $0xb0] sm:$0xff]  ;;  %v286_v19 = vld [vmem:[%s1573_s13 + $0xb8] sm:$0xff]  ;;  %s1718_s11 = scalar_lea.hbm %s1820_s3, %s955_s6  ;;  %s1274_s15 = scalar_lea.vmem %s1710_s14, 1024 }
  0x52   : > { %v297_v17 = vpack.c.bf16 %v268_v15, %v267_v14  ;;  %v269_v20 = vld [vmem:[%s1573_s13 + $0x30] sm:$0xff]  ;;  %v270_v21 = vld [vmem:[%s1573_s13 + $0x38] sm:$0xff]  ;;  %v287_v22 = vld [vmem:[%s1573_s13 + $0xc0] sm:$0xff]  ;;  %v306_v24 = vpack.c.bf16 %v286_v19, %v285_v18  ;;  %p1275_p3 = scmp.ne.s32.totalorder %s1710_s14, %s1274_s15  ;;  %p1849_p2 = scmp.ne.s32.totalorder %s1838_s29, 0 }
  0x53   : > { %v288_v23 = vld [vmem:[%s1573_s13 + $0xc8] sm:$0xff]  ;;  %v271_v25 = vld [vmem:[%s1573_s13 + $0x40] sm:$0xff]  ;;  %v1204_v27 = vld [vmem:[#allocation5 + $0x78] sm:$0xff]   ;;  %v298_v28 = vpack.c.bf16 %v270_v21, %v269_v20  ;;  %s1413_s22 = smov [#allocation7]  }
  0x54   : > { %367 = vxpose.xlu0.c.b16.cont [2/8] %v304_v10, 128  ;;  %v272_v26 = vld [vmem:[%s1573_s13 + $0x48] sm:$0xff]  ;;  %v1205_v29 = vld [vmem:[#allocation5 + $0x38] sm:$0xff]   ;;  %1023 = vmatprep.subr.bf16.mxu0 %v1204_v27  ;;  %v1206_v30 = vld [vmem:[#allocation5 + $0x70] sm:$0xff]   ;;  %v307_v34 = vpack.c.bf16 %v288_v23, %v287_v22  ;;  %p1276_p7 = pnand %p1275_p3, %p1849_p2  ;;  %s1278_s10 = sshll.u32 %s1413_s22, 4  ;;  %s1279_s10 = int_to_ptr.vmem [resolvable:$false] %s1278_s10 }
  0x55   : > { %351 = vxpose.xlu1.c.b16.cont [2/8] %v296_v11, 128  ;;  %1087 = vmatprep.subr.bf16.mxu1 %v1204_v27  ;;  %v289_v31 = vld [vmem:[%s1573_s13 + $0xd0] sm:$0xff]  ;;  %v290_v32 = vld [vmem:[%s1573_s13 + $0xd8] sm:$0xff]  ;;  %v1208_v35 = vld [vmem:[#allocation5 + $0x68] sm:$0xff]   ;;  %v299_v36 = vpack.c.bf16 %v272_v26, %v271_v25  ;;  %s1280_s7 = scalar_lea.vmem %s1279_s10, 2048  ;;  %p1281_p9 = scmp.lt.s32.totalorder %s1710_s14, %s1279_s10 }
  0x56   : > { %1024 = vmatpush3.bf16.msra.mxu0 %v1205_v29  ;;  %v1207_v33 = vld [vmem:[#allocation5 + $0x30] sm:$0xff]   ;;  %1095 = vmatpush3.bf16.msra.mxu1 %v1205_v29  ;;  %v274_v38 = vld [vmem:[%s1573_s13 + $0x58] sm:$0xff]  ;;  %v291_v39 = vld [vmem:[%s1573_s13 + $0xe0] sm:$0xff]  ;;  %v308_v42 = vpack.c.bf16 %v290_v32, %v289_v31  ;;  %p1277_p8 = pneg %p1276_p7  ;;  %p1282_p12 = scmp.lt.s32.totalorder %s1280_s7, %s1274_s15 }
  0x57   : > { %1025 = vmatprep.subr.bf16.mxu0 %v1206_v30  ;;  %v273_v37 = vld [vmem:[%s1573_s13 + $0x50] sm:$0xff]  ;;  %1088 = vmatprep.subr.bf16.mxu1 %v1206_v30  ;;  %v292_v40 = vld [vmem:[%s1573_s13 + $0xe8] sm:$0xff]  ;;  %v1210_v43 = vld [vmem:[#allocation5 + $0x60] sm:$0xff]  }
  0x58   : > { %368 = vxpose.xlu0.c.b16.cont [3/8] %v305_v16, 128  ;;  %v1209_v41 = vld [vmem:[#allocation5 + $0x28] sm:$0xff]   ;;  %v300_v44 = vpack.c.bf16 %v274_v38, %v273_v37  ;;  %v275_v45 = vld [vmem:[%s1573_s13 + $0x60] sm:$0xff]  ;;  %v293_v47 = vld [vmem:[%s1573_s13 + $0xf0] sm:$0xff]  ;;  %v309_v50 = vpack.c.bf16 %v292_v40, %v291_v39  ;;  %p1283_p13 = por %p1282_p12, %p1281_p9 }
  0x59   : > { %352 = vxpose.xlu1.c.b16.cont [3/8] %v297_v17, 128  ;;  %v276_v46 = vld [vmem:[%s1573_s13 + $0x68] sm:$0xff]  ;;  %v294_v48 = vld [vmem:[%s1573_s13 + $0xf8] sm:$0xff]  ;;  %v1211_v49 = vld [vmem:[#allocation5 + $0x20] sm:$0xff]  }
  0x5a   : > { %1026 = vmatpush3.bf16.msra.mxu0 %v1207_v33  ;;  %1096 = vmatpush3.bf16.msra.mxu1 %v1207_v33  ;;  %v1212_v51 = vld [vmem:[#allocation5 + $0x58] sm:$0xff]   ;;  %v301_v52 = vpack.c.bf16 %v276_v46, %v275_v45  ;;  %v277_v53 = vld [vmem:[%s1573_s13 + $0x70] sm:$0xff]  ;;  %v310_v56 = vpack.c.bf16 %v294_v48, %v293_v47  ;;  %v1216_v60 = vld [vmem:[#allocation5 + $0x48] sm:$0xff]   ;;  %p1284_p0 = pnand %p1283_p13, %p1277_p8 }
  0x5b   : > { %1027 = vmatprep.subr.bf16.mxu0 %v1208_v35  ;;  %1089 = vmatprep.subr.bf16.mxu1 %v1208_v35  ;;  %v278_v54 = vld [vmem:[%s1573_s13 + $0x78] sm:$0xff]  ;;  %v1214_v57 = vld [vmem:[#allocation5 + $0x50] sm:$0xff]   ;;  %v1217_v61 = vld [vmem:[#allocation5 + $0x8] sm:$0xff]  }
  0x5c   : > { %369 = vxpose.xlu0.c.b16.cont [4/8] %v306_v24, 128  ;;  %v1213_v55 = vld [vmem:[#allocation5 + $0x18] sm:$0xff]   ;;  %v302_v58 = vpack.c.bf16 %v278_v54, %v277_v53  ;;  %v1215_v59 = vld [vmem:[#allocation5 + $0x10] sm:$0xff]   ;;  %v1218_v62 = vld [vmem:[#allocation5 + $0x40] sm:$0xff]  }
  0x5d   : > { %353 = vxpose.xlu1.c.b16.cont [4/8] %v298_v28, 128  ;;  %v1219_v63 = vld [vmem:[#allocation5] sm:$0xff]  }
  0x5e   : > { %1028 = vmatpush3.bf16.msra.mxu0 %v1209_v41  ;;  %1097 = vmatpush3.bf16.msra.mxu1 %v1209_v41  ;;  %v1618_v20 = vld [vmem:[%s1819_s2] ss:$0 sm:$0xff] }
  0x5f   : > { %1029 = vmatprep.subr.bf16.mxu0 %v1210_v43  ;;  %1090 = vmatprep.subr.bf16.mxu1 %v1210_v43 }
  0x60   : > { %370 = vxpose.xlu0.c.b16.cont [5/8] %v307_v34, 128 }
  0x61   : > { %354 = vxpose.xlu1.c.b16.cont [5/8] %v299_v36, 128 }
  0x62   : > { %1030 = vmatpush3.bf16.msra.mxu0 %v1211_v49  ;;  %1098 = vmatpush3.bf16.msra.mxu1 %v1211_v49 }
  0x63   : > { %1031 = vmatprep.subr.bf16.mxu0 %v1212_v51  ;;  %1091 = vmatprep.subr.bf16.mxu1 %v1212_v51 }
  0x64   : > { %371 = vxpose.xlu0.c.b16.cont [6/8] %v308_v42, 128 }
  0x65   : > { %355 = vxpose.xlu1.c.b16.cont [6/8] %v300_v44, 128 }
  0x66   : > { %1032 = vmatpush3.bf16.msra.mxu0 %v1213_v55  ;;  %1099 = vmatpush3.bf16.msra.mxu1 %v1213_v55 }
  0x67   : > { %1033 = vmatprep.subr.bf16.mxu0 %v1214_v57  ;;  %1092 = vmatprep.subr.bf16.mxu1 %v1214_v57 }
  0x68   : > { %372 = vxpose.xlu0.c.b16.cont [7/8] %v309_v50, 128 }
  0x69   : > { %356 = vxpose.xlu1.c.b16.cont [7/8] %v301_v52, 128 }
  0x6a   : > { %1034 = vmatpush3.bf16.msra.mxu0 %v1215_v59  ;;  %1100 = vmatpush3.bf16.msra.mxu1 %v1215_v59 }
  0x6b   : > { %1035 = vmatprep.subr.bf16.mxu0 %v1216_v60  ;;  %1093 = vmatprep.subr.bf16.mxu1 %v1216_v60 }
  0x6c   : > { %373 = vxpose.xlu0.c.b16.end [8/8] %v310_v56, 128 }
  0x6d   : > { %357 = vxpose.xlu1.c.b16.end [8/8] %v302_v58, 128 }
  0x6e   : > { %1036 = vmatpush3.bf16.msra.mxu0 %v1217_v61  ;;  %1101 = vmatpush3.bf16.msra.mxu1 %v1217_v61 }
  0x6f   : > { %1037 = vmatprep.subr.bf16.mxu0 %v1218_v62  ;;  %1094 = vmatprep.subr.bf16.mxu1 %v1218_v62 }
  0x72   : > { %1038 = vmatpush3.bf16.msra.mxu0 %v1219_v63  ;;  %1102 = vmatpush3.bf16.msra.mxu1 %v1219_v63 }
  0xb2   : > { %v374_v0 = vpop.trf.xlu0 }
  0xb3   : > { %510 = vmatprep.mubr.bf16.mxu0 %v374_v0  ;;  %v358_v1 = vpop.trf.xlu1 }
  0xb4   : > { %511 = vmatmul.mubr.bf16.vlgmr.msra.gmra.mxu0 %v358_v1 }
  0xb6   : > { %v375_v2 = vpop.trf.xlu0 }
  0xb7   : > { %518 = vmatprep.mubr.bf16.mxu0 %v375_v2  ;;  %v359_v3 = vpop.trf.xlu1 }
  0xba   : > { %v376_v4 = vpop.trf.xlu0 }
  0xbb   : > { %v360_v5 = vpop.trf.xlu1 }
  0xbc   : > { %519 = vmatmul.mubr.bf16.gmra.mxu0 %v359_v3 }
  0xbd   : > { %526 = vmatprep.mubr.bf16.mxu0 %v376_v4 }
  0xbe   : > { %v377_v6 = vpop.trf.xlu0 }
  0xbf   : > { %v361_v7 = vpop.trf.xlu1 }
  0xc2   : > { %v378_v8 = vpop.trf.xlu0 }
  0xc3   : > { %542 = vmatprep.mubr.bf16.mxu1 %v378_v8  ;;  %v362_v9 = vpop.trf.xlu1 }
  0xc4   : > { %527 = vmatmul.mubr.bf16.gmra.mxu0 %v360_v5  ;;  %543 = vmatmul.mubr.bf16.vlgmr.msra.gmra.mxu1 %v362_v9 }
  0xc5   : > { %534 = vmatprep.mubr.bf16.mxu0 %v377_v6 }
  0xc6   : > { %v379_v10 = vpop.trf.xlu0 }
  0xc7   : > { %550 = vmatprep.mubr.bf16.mxu1 %v379_v10  ;;  %v363_v11 = vpop.trf.xlu1 }
  0xca   : > { %v380_v12 = vpop.trf.xlu0 }
  0xcb   : > { %v364_v13 = vpop.trf.xlu1 }
  0xcc   : > { %535 = vmatmul.mubr.bf16.gmra.mxu0 %v361_v7  ;;  %551 = vmatmul.mubr.bf16.gmra.mxu1 %v363_v11 }
  0xcd   : > { %558 = vmatprep.mubr.bf16.mxu1 %v380_v12 }
  0xce   : > { %v381_v14 = vpop.trf.xlu0 }
  0xcf   : > { %v365_v15 = vpop.trf.xlu1 }
  0xd4   : > { %559 = vmatmul.mubr.bf16.gmra.mxu1 %v364_v13 }
  0xd5   : > { %566 = vmatprep.mubr.bf16.mxu1 %v381_v14 }
  0xdc   : > { %567 = vmatmul.mubr.bf16.gmra.mxu1 %v365_v15 }
 0x174   : > { %v1039_v16 = vpop.f32.mrf.mxu0 }
 0x176   : > { %v1040_v17 = vpop.f32.mrf.mxu0 }
 0x177   : > { %v1041_v19 = vadd.f32 %v1040_v17, %v1039_v16 }
 0x178   : > { %v1042_v18 = vpop.f32.mrf.mxu0 }
 0x179   : > { %v1622_v24 = vadd.f32 %v1041_v19, %v1618_v20 }
 0x17a   : > { %v1043_v21 = vpop.f32.mrf.mxu0 }
 0x17b   : > { %v1044_v22 = vadd.f32 %v1043_v21, %v1042_v18 }
 0x17c   : > { %v1045_v23 = vpop.f32.mrf.mxu0 }
 0x17d   : > { %v1625_v25 = vadd.f32 %v1044_v22, %v1618_v20 }
 0x17e   : > { %v1046_v26 = vpop.f32.mrf.mxu0 }
 0x17f   : > { %v979_v27 = vpack.c.bf16 %v1625_v25, %v1622_v24  ;;  %v1047_v29 = vadd.f32 %v1046_v26, %v1045_v23  ;;  %v655_v43 = vadd.f32 %v1625_v25, %v1622_v24 }
 0x180   : > { %v1048_v28 = vpop.f32.mrf.mxu0 }
 0x181   : > { %980 = vst [vmem:[%s1629_s5] sm:$0xff] %v979_v27   ;;  %v1633_v34 = vadd.f32 %v1047_v29, %v1618_v20 }
 0x182   : > { %v1049_v30 = vpop.f32.mrf.mxu0 }
 0x183   : > { %v1050_v31 = vadd.f32 %v1049_v30, %v1048_v28  ;;  %v656_v48 = vadd.f32 %v655_v43, %v1633_v34 }
 0x184   : > { %v1051_v32 = vpop.f32.mrf.mxu0  ;;  %v1063_v33 = vpop.f32.mrf.mxu1 }
 0x185   : > { %v1636_v35 = vadd.f32 %v1050_v31, %v1618_v20 }
 0x186   : > { %v1052_v36 = vpop.f32.mrf.mxu0  ;;  %v1064_v37 = vpop.f32.mrf.mxu1 }
 0x187   : > { %v984_v38 = vpack.c.bf16 %v1636_v35, %v1633_v34  ;;  %v1053_v41 = vadd.f32 %v1052_v36, %v1051_v32  ;;  %v1065_v42 = vadd.f32 %v1064_v37, %v1063_v33  ;;  %v657_v57 = vadd.f32 %v656_v48, %v1636_v35 }
 0x188   : > { %v1054_v39 = vpop.f32.mrf.mxu0  ;;  %v1066_v40 = vpop.f32.mrf.mxu1 }
 0x189   : > { %1016 = vst [vmem:[%s1629_s5 + $0x8] sm:$0xff] %v984_v38   ;;  %v1645_v51 = vadd.f32 %v1053_v41, %v1618_v20  ;;  %v1648_v52 = vadd.f32 %v1065_v42, %v1618_v20 }
 0x18a   : > { %v1055_v44 = vpop.f32.mrf.mxu0  ;;  %v1067_v45 = vpop.f32.mrf.mxu1 }
 0x18b   : > { %v1056_v46 = vadd.f32 %v1055_v44, %v1054_v39  ;;  %v1068_v47 = vadd.f32 %v1067_v45, %v1066_v40  ;;  %v658_v63 = vadd.f32 %v657_v57, %v1645_v51 }
 0x18c   : > { %v1057_v49 = vpop.f32.mrf.mxu0  ;;  %v1069_v50 = vpop.f32.mrf.mxu1 }
 0x18d   : > { %v1651_v53 = vadd.f32 %v1056_v46, %v1618_v20  ;;  %v1654_v54 = vadd.f32 %v1068_v47, %v1618_v20 }
 0x18e   : > { %v1058_v55 = vpop.f32.mrf.mxu0  ;;  %v1070_v56 = vpop.f32.mrf.mxu1 }
 0x18f   : > { %v989_v58 = vpack.c.bf16 %v1651_v53, %v1645_v51  ;;  %v999_v59 = vpack.c.bf16 %v1654_v54, %v1648_v52  ;;  %v1059_v60 = vadd.f32 %v1058_v55, %v1057_v49  ;;  %v1071_v1 = vadd.f32 %v1070_v56, %v1069_v50 }
 0x190   : > { %v1060_v61 = vpop.f32.mrf.mxu0  ;;  %v1072_v62 = vpop.f32.mrf.mxu1  ;;  %v659_v4 = vadd.f32 %v658_v63, %v1651_v53 }
 0x191   : > { %1017 = vst [vmem:[%s1629_s5 + $0x10] sm:$0xff] %v989_v58   ;;  %1019 = vst [vmem:[%s1629_s5 + $0x20] sm:$0xff] %v999_v59   ;;  %v1665_v0 = vadd.f32 %v1059_v60, %v1618_v20  ;;  %v1670_v9 = vadd.f32 %v1071_v1, %v1618_v20 }
 0x192   : > { %v1061_v2 = vpop.f32.mrf.mxu0  ;;  %v1073_v3 = vpop.f32.mrf.mxu1 }
 0x193   : > { %v1062_v5 = vadd.f32 %v1061_v2, %v1060_v61  ;;  %v1074_v6 = vadd.f32 %v1073_v3, %v1072_v62  ;;  %v660_v8 = vadd.f32 %v659_v4, %v1665_v0 }
 0x194   : > { %v1075_v7 = vpop.f32.mrf.mxu1 }
 0x195   : > { %v1673_v10 = vadd.f32 %v1062_v5, %v1618_v20  ;;  %v1676_v11 = vadd.f32 %v1074_v6, %v1618_v20 }
 0x196   : > { %v1076_v12 = vpop.f32.mrf.mxu1 }
 0x197   : > { %v994_v13 = vpack.c.bf16 %v1673_v10, %v1665_v0  ;;  %v661_v14 = vadd.f32 %v660_v8, %v1673_v10  ;;  %v1004_v15 = vpack.c.bf16 %v1676_v11, %v1670_v9  ;;  %v1077_v18 = vadd.f32 %v1076_v12, %v1075_v7 }
 0x198   : > { %v1078_v16 = vpop.f32.mrf.mxu1 }
 0x199   : > { %1018 = vst [vmem:[%s1629_s5 + $0x18] sm:$0xff] %v994_v13   ;;  %v662_v17 = vadd.f32 %v661_v14, %v1648_v52  ;;  %1020 = vst [vmem:[%s1629_s5 + $0x28] sm:$0xff] %v1004_v15   ;;  %v1689_v27 = vadd.f32 %v1077_v18, %v1618_v20 }
 0x19a   : > { %v1079_v19 = vpop.f32.mrf.mxu1 }
 0x19b   : > { %v663_v21 = vadd.f32 %v662_v17, %v1654_v54  ;;  %v1080_v22 = vadd.f32 %v1079_v19, %v1078_v16 }
 0x19c   : > { %v1081_v23 = vpop.f32.mrf.mxu1 }
 0x19d   : > { %v664_v26 = vadd.f32 %v663_v21, %v1670_v9  ;;  %v1692_v28 = vadd.f32 %v1080_v22, %v1618_v20 }
 0x19e   : > { %v1082_v29 = vpop.f32.mrf.mxu1 }
 0x19f   : > { %v665_v30 = vadd.f32 %v664_v26, %v1676_v11  ;;  %v1009_v31 = vpack.c.bf16 %v1692_v28, %v1689_v27  ;;  %v1083_v32 = vadd.f32 %v1082_v29, %v1081_v23 }
 0x1a0   : > { %v1084_v33 = vpop.f32.mrf.mxu1 }
 0x1a1   : > { %v666_v36 = vadd.f32 %v665_v30, %v1689_v27  ;;  %1021 = vst [vmem:[%s1629_s5 + $0x30] sm:$0xff] %v1009_v31   ;;  %v1703_v39 = vadd.f32 %v1083_v32, %v1618_v20 }
 0x1a2   : > { %v1085_v37 = vpop.f32.mrf.mxu1 }
 0x1a3   : > { %v667_v38 = vadd.f32 %v666_v36, %v1692_v28  ;;  %v1086_v40 = vadd.f32 %v1085_v37, %v1084_v33 }
 0x1a5   : > { %v668_v41 = vadd.f32 %v667_v38, %v1703_v39  ;;  %v1708_v42 = vadd.f32 %v1086_v40, %v1618_v20 }
 0x1a7   : > { %v1014_v43 = vpack.c.bf16 %v1708_v42, %v1703_v39  ;;  %v669_v44 = vadd.f32 %v668_v41, %v1708_v42 }
 0x1a9   : > { %1022 = vst [vmem:[%s1629_s5 + $0x38] sm:$0xff] %v1014_v43   ;;  %v670_v45 = vrot.slane %v669_v44, 4 }
 0x1aa   : > { %1287 = shalt.err (!%p1284_p0)
}
 0x1ab   : > { %s1288_s13 = scalar_lea.hbm %s1718_s11, 1024  ;;  %s1292_s30 = scalar_lea.hbm %s1820_s3, 4096 }
 0x1ac   : > { %p1289_p1 = scmp.ne.s32.totalorder %s1718_s11, %s1288_s13  ;;  %p1293_p10 = scmp.lt.s32.totalorder %s1718_s11, %s1820_s3 }
 0x1ad   : > { %p1294_p11 = scmp.lt.s32.totalorder %s1292_s30, %s1288_s13 }
 0x1ae   : > { %p1290_p4 = pnand %p1289_p1, %p1849_p2 }
 0x1af   : > { %p1295_p5 = por %p1294_p11, %p1293_p10 }
 0x1b0   : > { %p1291_p6 = pneg %p1290_p4 }
 0x1b2   : > { %p1296_p3 = pnand %p1295_p5, %p1291_p6 }
 0x1b4   : > { %1299 = shalt.err (!%p1296_p3)
}
 0x1b5   : > { %s1414_s23 = smov 64   ;;  %s1415_s12 = smov 4   ;;  %v671_v20 = vadd.f32 %v670_v45, %v669_v44  ;;  %vm731_vm0 = vcmask 1040384   ;;  %vm733_vm1 = vcmask 1041408  }
 0x1b6   : > { %1109 = dma.vmem_to_hbm [thread:$0]  (%p1849_p2), %s1710_s14, 1024, %s1718_s11, %s737_s1, %s1414_s23, %s1414_s23, %s1415_s12  }
 0x1b7   : > { %v672_v46 = vrot.slane %v671_v20, 2  ;;  %s917_s14 = sshll.u32 %s1569_s27, 3  ;;  %s956_s6 = sshll.u32 %s1392_s19, 1 }
 0x1b8   : > { %s771_s25 = sadd.s32 %s1388_s18, %s956_s6  ;;  %s260_s11 = scalar_lea.vmem [#allocation8], %s917_s14 }
 0x1b9   : > { %v673_v47 = vadd.f32 %v672_v46, %v671_v20  ;;  %s957_s8 = sshll.u32 %s771_s25, 7  ;;  %s775_s1 = sshll.u32 %s260_s11, 4  ;;  %s776_s1 = int_to_ptr.vmem [resolvable:$true] %s775_s1 }
 0x1ba   : > { %s1850_s10 = sld [smem:[#allocation19_spill]]  ;;  %s742_s19 = scalar_lea.sflag [#allocation9], %s1569_s27 }
 0x1bb   : > { %v674_v48 = vrot.slane %v673_v47, 1  ;;  %s1300_s18 = scalar_lea.vmem %s776_s1, 128  ;;  %s1416_s13 = smov [#allocation8]  }
 0x1bc   : > { %p1301_p7 = scmp.ne.s32.totalorder %s776_s1, %s1300_s18  ;;  %s1304_s26 = sshll.u32 %s1416_s13, 4  ;;  %s1305_s26 = int_to_ptr.vmem [resolvable:$false] %s1304_s26 }
 0x1bd   : > { %v1744_v49 = vadd.f32 %v674_v48, %v673_v47  ;;  %s1306_s28 = scalar_lea.vmem %s1305_s26, 256  ;;  %p1307_p12 = scmp.lt.s32.totalorder %s776_s1, %s1305_s26 }
 0x1be   : > { %p1302_p8 = pnand %p1301_p7, %p1849_p2  ;;  %p1308_p13 = scmp.lt.s32.totalorder %s1306_s28, %s1300_s18 }
 0x1bf   : > { %v677_v50 = vmul.f32 0.0078125, %v1744_v49 }
 0x1c0   : > { %s1770_s7 = scalar_lea.hbm %s1850_s10, %s957_s8  ;;  %p1303_p9 = pneg %p1302_p8 }
 0x1c1   : > { %v678_v55 = vsub.f32 %v1622_v24, %v677_v50  ;;  %v679_v56 = vsub.f32 %v1625_v25, %v677_v50  ;;  %v680_v57 = vsub.f32 %v1633_v34, %v677_v50  ;;  %v681_v60 = vsub.f32 %v1636_v35, %v677_v50  ;;  %p1309_p0 = por %p1308_p13, %p1307_p12 }
 0x1c2   : > { %v682_v61 = vsub.f32 %v1645_v51, %v677_v50  ;;  %v683_v1 = vsub.f32 %v1651_v53, %v677_v50  ;;  %v684_v4 = vsub.f32 %v1665_v0, %v677_v50  ;;  %v685_v25 = vsub.f32 %v1673_v10, %v677_v50 }
 0x1c3   : > { %v694_v58 = vmul.f32 %v678_v55, %v678_v55  ;;  %v695_v59 = vmul.f32 %v679_v56, %v679_v56  ;;  %v696_v62 = vmul.f32 %v680_v57, %v680_v57  ;;  %v697_v2 = vmul.f32 %v681_v60, %v681_v60  ;;  %p1310_p1 = pnand %p1309_p0, %p1303_p9 }
 0x1c4   : > { %v698_v5 = vmul.f32 %v682_v61, %v682_v61  ;;  %v699_v6 = vmul.f32 %v683_v1, %v683_v1  ;;  %v686_v7 = vsub.f32 %v1648_v52, %v677_v50  ;;  %v700_v8 = vmul.f32 %v684_v4, %v684_v4 }
 0x1c5   : > { %v710_v63 = vadd.f32 %v695_v59, %v694_v58  ;;  %v687_v51 = vsub.f32 %v1654_v54, %v677_v50  ;;  %v701_v12 = vmul.f32 %v685_v25, %v685_v25  ;;  %v688_v53 = vsub.f32 %v1670_v9, %v677_v50 }
 0x1c6   : > { %v702_v14 = vmul.f32 %v686_v7, %v686_v7  ;;  %v689_v0 = vsub.f32 %v1676_v11, %v677_v50  ;;  %v690_v10 = vsub.f32 %v1689_v27, %v677_v50  ;;  %v691_v52 = vsub.f32 %v1692_v28, %v677_v50 }
 0x1c7   : > { %v711_v3 = vadd.f32 %v710_v63, %v696_v62  ;;  %v703_v16 = vmul.f32 %v687_v51, %v687_v51  ;;  %v704_v18 = vmul.f32 %v688_v53, %v688_v53  ;;  %v692_v22 = vsub.f32 %v1703_v39, %v677_v50 }
 0x1c8   : > { %v705_v21 = vmul.f32 %v689_v0, %v689_v0  ;;  %v706_v23 = vmul.f32 %v690_v10, %v690_v10  ;;  %v693_v26 = vsub.f32 %v1708_v42, %v677_v50  ;;  %v707_v11 = vmul.f32 %v691_v52, %v691_v52 }
 0x1c9   : > { %v712_v24 = vadd.f32 %v711_v3, %v697_v2  ;;  %v708_v30 = vmul.f32 %v692_v22, %v692_v22 }
 0x1ca   : > { %v709_v27 = vmul.f32 %v693_v26, %v693_v26 }
 0x1cb   : > { %v713_v34 = vadd.f32 %v712_v24, %v698_v5 }
 0x1cd   : > { %v714_v35 = vadd.f32 %v713_v34, %v699_v6 }
 0x1cf   : > { %v715_v13 = vadd.f32 %v714_v35, %v700_v8 }
 0x1d1   : > { %v716_v15 = vadd.f32 %v715_v13, %v701_v12 }
 0x1d3   : > { %v717_v17 = vadd.f32 %v716_v15, %v702_v14 }
 0x1d5   : > { %v718_v19 = vadd.f32 %v717_v17, %v703_v16 }
 0x1d7   : > { %v719_v54 = vadd.f32 %v718_v19, %v704_v18 }
 0x1d9   : > { %v720_v9 = vadd.f32 %v719_v54, %v705_v21 }
 0x1db   : > { %v721_v29 = vadd.f32 %v720_v9, %v706_v23 }
 0x1dd   : > { %v722_v31 = vadd.f32 %v721_v29, %v707_v11 }
 0x1df   : > { %v723_v32 = vadd.f32 %v722_v31, %v708_v30 }
 0x1e1   : > { %v724_v33 = vadd.f32 %v723_v32, %v709_v27 }
 0x1e3   : > { %v725_v36 = vrot.slane %v724_v33, 4 }
 0x1e5   : > { %v726_v28 = vadd.f32 %v725_v36, %v724_v33 }
 0x1e7   : > { %v727_v37 = vrot.slane %v726_v28, 2 }
 0x1e9   : > { %v728_v38 = vadd.f32 %v727_v37, %v726_v28 }
 0x1eb   : > { %v729_v39 = vrot.slane %v728_v38, 1 }
 0x1ed   : > { %v730_v40 = vadd.f32 %v729_v39, %v728_v38 }
 0x1ef   : > { %v732_v41 = vsel %vm731_vm0, %v1744_v49, %v730_v40 }
 0x1f0   : > { %v734_v42 = vsel %vm733_vm1, %v732_v41, 0.0 }
 0x1f1   : > { %735 = vst [vmem:[%s260_s11] sm:$0xff] %v734_v42 }
 0x1f2   : > { %1313 = shalt.err (!%p1310_p1)
}
 0x1f3   : > { %s1314_s30 = scalar_lea.hbm %s1770_s7, 128  ;;  %s1318_s9 = scalar_lea.hbm %s1850_s10, 512 }
 0x1f4   : > { %p1315_p4 = scmp.ne.s32.totalorder %s1770_s7, %s1314_s30  ;;  %p1319_p11 = scmp.lt.s32.totalorder %s1770_s7, %s1850_s10 }
 0x1f5   : > { %p1320_p5 = scmp.lt.s32.totalorder %s1318_s9, %s1314_s30 }
 0x1f6   : > { %p1316_p6 = pnand %p1315_p4, %p1849_p2 }
 0x1f7   : > { %p1321_p3 = por %p1320_p5, %p1319_p11 }
 0x1f8   : > { %p1317_p10 = pneg %p1316_p6 }
 0x1fa   : > { %p1322_p7 = pnand %p1321_p3, %p1317_p10 }
 0x1fc   : > { %1325 = shalt.err (!%p1322_p7)
}
 0x1fd   : > { %1110 = dma.vmem_to_hbm [thread:$0]  (%p1849_p2), %s776_s1, 128, %s1770_s7, %s742_s19  }
 0x1fe PF: > { %s1851_s14 = sld [smem:[#allocation15_spill]] }
 0x1ff   : > { %s1852_s6 = sld [smem:[#allocation14_spill]] }
 0x200   : > { %s1853_s25 = sld [smem:[#allocation16_spill]] }
 0x204   : > { %p1131_p8 = scmp.ge.s32.totalorder %s1851_s14, 2 }
 0x205   : > { %s787_s8 = sand.u32 1, %s1852_s6  }
 0x206   : > { %p1854_p9 = scmp.ne.s32.totalorder %s1853_s25, 0  ;;  %s788_s11 = scalar_lea.sflag [#allocation4], %s787_s8 }
 0x208   : > { %p1122_p12 = pnand %p1131_p8, %p1854_p9 }
 0x20a   : > { %p1123_p13 = pneg %p1122_p12 }
 0x20c   : > { %1367 = dma.done.wait (%p1123_p13), %s788_s11, 1024  }
 0x20d   : > { %1369 = vsyncadd (%p1123_p13), %s788_s11, 4294966272  ;;  %s797_s15 = scalar_lea.sflag [#allocation9], %s787_s8 }
 0x20e   : > { %1371 = dma.done.wait (%p1123_p13), %s797_s15, 128  }
 0x20f   : > { %1373 = vsyncadd (%p1123_p13), %s797_s15, 4294967168  ;;  %s25_s22 = sadd.s32 1, %s1851_s14   ;;  %s1855_s29 = sld [smem:[#allocation17_spill]] }
 0x210   : > { %p22_p0 = scmp.ge.s32.totalorder %s25_s22, 6   ;;  %s1856_s15 = smov %s1380_s16 }
 0x211   : > { %s1857_s16 = smov %s1384_s17  ;;  %s1858_s17 = smov %s1560_s4 }
 0x212   : > { %s1859_s18 = smov %s1396_s20  ;;  %s1860_s19 = smov %s1400_s21 }
 0x213   : > { %s1862_s21 = smov %s1868_s24  ;;  %24 = sbr.rel (!%p22_p0) target bundleno = 13 (0xd), region = 98 }
 0x215   : > { %s1861_s20 = smov %s1855_s29 }
 0x218   :  { %802 = vsyncpa [#allocation3], 1 }
 0x219   :  { %804 = vsyncpa [#allocation3 + $0x1], 1 }
 0x21a   :  { %805 = vsyncpa [#allocation6], 1 }
 0x21b   :  { %806 = vsyncpa [#allocation4], 1 }
 0x21c   :  { %808 = vsyncpa [#allocation4 + $0x1], 1 }
 0x21d   :  { %809 = vsyncpa [#allocation9], 1 }
 0x21e   :  { %811 = vsyncpa [#allocation9 + $0x1], 1 }

</bundles_post_ra>
